<compile_context>
chip_gen: v6e
topology: v6e:2x2x1
jax: 0.10.0
libtpu: 0.0.40
codegen_flags: <defaults>
</compile_context>

<pallas_src>
import functools

import numpy as np
import jax
import jax.numpy as jnp
from jax.experimental import pallas as pl
from jax.experimental.pallas import tpu as pltpu


def _round_up(x, m):
    return (x + m - 1) // m * m


# ----------------------------------------------------------------------------
# Single source of truth for VMEM sizing (generation-aware).
#   v5e/v6e: 128 MiB physical -> 48 MiB scoped budget
#   v7x    :  64 MiB physical -> 24 MiB scoped budget (keeps headroom per TC)
# ----------------------------------------------------------------------------
def _vmem_budget_bytes():
    cap = 64 * 1024 * 1024
    try:
        info = pltpu.get_tpu_info()
        cap = int(getattr(info, "vmem_capacity_bytes", cap))
    except Exception:
        pass
    return max(8 * 1024 * 1024, min(48 * 1024 * 1024, (cap * 3) // 8))


# ----------------------------------------------------------------------------
# Kernel A: fused q/k linear projection, lane-dense (2, tile_n) output.
#   out[0, :] = w_q(feats),  out[1, :] = w_k(feats)
# ----------------------------------------------------------------------------
def qk_proj_kernel(x_ref, w_ref, b_ref, o_ref):
    # x_ref: (tile_n, D), w_ref: (2, D), b_ref: (2, 1) -> o_ref: (2, tile_n)
    o_ref[...] = (
        jax.lax.dot_general(
            w_ref[...],
            x_ref[...],
            dimension_numbers=(((1,), (1,)), ((), ())),
            preferred_element_type=jnp.float32,
        )
        + b_ref[...]
    )


def _pick_tile_n(n, d, usable):
    # bytes streamed per row: (D input + 2 output) * f32 * double buffering
    per_row = (d + 2) * 4 * 2
    cap = max(128, min(8192, (usable // per_row) // 128 * 128))
    if n <= cap:
        if n > 512:
            # keep >=2 grid steps so both v7x TensorCores get work
            return min(cap, _round_up(pl.cdiv(n, 2), 128))
        return n  # single block; block dims == array dims (any N allowed)
    return cap


def qk_projection(feats, W, b, budget=None):
    """feats (N, D), W (2, D), b (2, 1) -> (2, N).  No input padding copy."""
    N, D = feats.shape
    if budget is None:
        budget = _vmem_budget_bytes()
    tile_n = _pick_tile_n(N, D, (budget * 3) // 4)
    return pl.pallas_call(
        qk_proj_kernel,
        out_shape=jax.ShapeDtypeStruct((2, N), jnp.float32),
        grid=(pl.cdiv(N, tile_n),),          # partial/OOB last block is fine:
        in_specs=[                           # its garbage columns are never read
            pl.BlockSpec((tile_n, D), lambda i: (i, 0)),
            pl.BlockSpec((2, D), lambda i: (0, 0)),
            pl.BlockSpec((2, 1), lambda i: (0, 0)),
        ],
        out_specs=pl.BlockSpec((2, tile_n), lambda i: (0, i)),
        compiler_params=pltpu.CompilerParams(
            dimension_semantics=("parallel",),
            vmem_limit_bytes=budget,
        ),
    )(feats, W, b)


# ----------------------------------------------------------------------------
# Kernel B: per-edge attention scores eij = ei * ej  (row-broadcast multiply).
# softmax(eij) is strictly order-preserving and the scores are only fed to
# np.argsort, so the full softmax (mask / max / exp / sum / reciprocal) is
# skipped entirely; the kernel is a pure DMA-limited elementwise stream.
# ----------------------------------------------------------------------------
def eij_kernel(ei_ref, ej_ref, o_ref):
    o_ref[...] = ei_ref[...] * ej_ref[...]


def _pick_tile_e(e, m_pad, usable):
    # bytes streamed per row: (ej in + out + ei col) * f32 * double buffering
    per_row = (2 * m_pad + 1) * 4 * 2
    cap = max(8, min(4096, (usable // per_row) // 8 * 8))
    e_full = _round_up(e, 8)
    if e_full <= cap:
        if e_full > 512:
            # keep >=2 grid steps so both v7x TensorCores get work
            return min(cap, _round_up(pl.cdiv(e_full, 2), 8))
        return e_full
    return cap


def eij_scores(ei, ej, tile_e, budget):
    E_pad, M_pad = ej.shape
    return pl.pallas_call(
        eij_kernel,
        out_shape=jax.ShapeDtypeStruct((E_pad, M_pad), jnp.float32),
        grid=(E_pad // tile_e,),
        in_specs=[
            pl.BlockSpec((tile_e, 1), lambda i: (i, 0)),
            pl.BlockSpec((tile_e, M_pad), lambda i: (i, 0)),
        ],
        out_specs=pl.BlockSpec((tile_e, M_pad), lambda i: (i, 0)),
        compiler_params=pltpu.CompilerParams(
            dimension_semantics=("parallel",),
            vmem_limit_bytes=budget,
        ),
    )(ei, ej)


# ----------------------------------------------------------------------------
# Fused device pipeline: projection -> gathers -> score kernel -> slice.
# One dispatch; only int32 indices go host->device, only (E, M) comes back.
# ----------------------------------------------------------------------------
@functools.partial(jax.jit, static_argnames=("tile_e", "n_rows", "n_cols"))
def _device_scores(feats, W, b, first, neigh, *, tile_e, n_rows, n_cols):
    budget = _vmem_budget_bytes()
    qk = qk_projection(feats, W, b, budget)      # (2, N)  Pallas / MXU
    q, k = qk[0], qk[1]
    ei = jnp.take(q, first).reshape(-1, 1)       # (E_pad, 1)
    # TODO(synk): Mosaic has no general in-kernel VMEM gather, so the ej gather
    # stays in XLA (fused under this jit); an in-kernel gather would save one
    # more HBM pass over the (E_pad, M_pad) tensor.
    ej = jnp.take(k, neigh, axis=0)              # (E_pad, M_pad)
    eij = eij_scores(ei, ej, tile_e, budget)     # Pallas elementwise stream
    return eij[:n_rows, :n_cols]                 # drop padding before transfer


# ----------------------------------------------------------------------------
# Module wrapper reproducing Attention.forward semantics
# ----------------------------------------------------------------------------
class AttentionPallas:
    def __init__(self, dim_in, key):
        self.dim_in = dim_in
        kqw, kqb, kkw, kkb = jax.random.split(key, 4)
        bound = 1.0 / float(np.sqrt(dim_in))  # nn.Linear default init range
        wq = jax.random.uniform(kqw, (1, dim_in), jnp.float32, -bound, bound)
        bq = jax.random.uniform(kqb, (1, 1), jnp.float32, -bound, bound)
        wk = jax.random.uniform(kkw, (1, dim_in), jnp.float32, -bound, bound)
        bk = jax.random.uniform(kkb, (1, 1), jnp.float32, -bound, bound)
        self.W = jnp.concatenate([wq, wk], axis=0)   # (2, D): rows [w_q ; w_k]
        self.b = jnp.concatenate([bq, bk], axis=0)   # (2, 1)

    def forward(self, feats, edge_dict, ks):
        n_edge = len(edge_dict)

        # --- hot path: q/k projection + per-edge scores in one device dispatch.
        multi = [i for i in range(n_edge) if len(edge_dict[i]) > 2]
        scores = {}
        if multi:
            E = len(multi)
            M = max(len(edge_dict[i]) - 1 for i in multi)
            # TODO(synk): heavily skewed neighbour counts would benefit from
            # bucketing by M instead of padding every row to the global max.
            M_pad = _round_up(M, 128)
            budget = _vmem_budget_bytes()
            tile_e = _pick_tile_e(E, M_pad, (budget * 3) // 4)
            E_pad = _round_up(E, tile_e)

            neigh = np.zeros((E_pad, M_pad), np.int32)   # padded idx 0 is in-range
            first = np.zeros((E_pad,), np.int32)
            for r, i in enumerate(multi):
                nb = edge_dict[i][1:]
                neigh[r, : len(nb)] = nb
                first[r] = edge_dict[i][0]

            eij = _device_scores(
                feats, self.W, self.b,
                jnp.asarray(first), jnp.asarray(neigh),
                tile_e=tile_e, n_rows=E, n_cols=M,
            )
            eij = np.asarray(jax.block_until_ready(eij))
            for r, i in enumerate(multi):
                scores[i] = eij[r, : len(edge_dict[i]) - 1]

        # --- host-side structural assembly (matches the reference exactly) ---
        # TODO(synk): argsort + variable-length index-list building have no clean
        # Pallas equivalent (data-dependent shapes); kept on host like the reference.
        structure_edge = []
        for i in range(n_edge):
            n_point = len(edge_dict[i])
            if n_point == 1:
                arr = np.ones(shape=(ks,)) * i
                structure_edge.append(arr.tolist().copy())
            elif n_point == 2:
                if ks % 2 == 0:
                    arr1 = np.ones(shape=(int(ks / 2),)) * i
                    arr2 = np.ones(shape=(int(ks / 2),)) * edge_dict[i][1]
                else:
                    arr1 = np.ones(shape=(int(ks / 2) + 1,)) * i
                    arr2 = np.ones(shape=(int(ks / 2),)) * edge_dict[i][1]
                arr = np.hstack((arr1, arr2))
                structure_edge.append(arr.tolist().copy())
            else:
                edge_array = np.array(edge_dict[i])
                new = np.delete(edge_array, 0)
                score = scores[i]
                idx = np.argsort(score)          # softmax is order-preserving
                new_idx = new[idx]
                new_idx = np.insert(new_idx, 0, i)
                new_list = new_idx.tolist()
                if int(ks / new_idx.shape[0]) >= 1:
                    num_repeat = int(ks / new_idx.shape[0])
                    repeat_arr = (
                        new_list * num_repeat + new_list[: ks % new_idx.shape[0]]
                    )
                else:
                    repeat_arr = new_list[:ks]
                structure_edge.append(repeat_arr.copy())
        return structure_edge


# ----------------------------------------------------------------------------
# pure-numpy reference of the PyTorch forward (for the end-to-end check)
# ----------------------------------------------------------------------------
def _reference_forward_numpy(feats, W, b, edge_dict, ks):
    feats = np.asarray(feats, np.float64)
    W = np.asarray(W, np.float64)
    b = np.asarray(b, np.float64)
    q = feats @ W[0] + b[0, 0]
    k = feats @ W[1] + b[1, 0]
    structure_edge = []
    for i in range(len(edge_dict)):
        n_point = len(edge_dict[i])
        if n_point == 1:
            structure_edge.append((np.ones((ks,)) * i).tolist())
        elif n_point == 2:
            if ks % 2 == 0:
                arr1 = np.ones((int(ks / 2),)) * i
                arr2 = np.ones((int(ks / 2),)) * edge_dict[i][1]
            else:
                arr1 = np.ones((int(ks / 2) + 1,)) * i
                arr2 = np.ones((int(ks / 2),)) * edge_dict[i][1]
            structure_edge.append(np.hstack((arr1, arr2)).tolist())
        else:
            new = np.array(edge_dict[i][1:])
            eij = q[edge_dict[i][0]] * k[new]
            ex = np.exp(eij - eij.max())
            aij = ex / ex.sum()
            idx = np.argsort(aij)
            new_idx = np.insert(new[idx], 0, i)
            new_list = new_idx.tolist()
            if int(ks / new_idx.shape[0]) >= 1:
                num_repeat = int(ks / new_idx.shape[0])
                repeat_arr = new_list * num_repeat + new_list[: ks % new_idx.shape[0]]
            else:
                repeat_arr = new_list[:ks]
            structure_edge.append(repeat_arr)
    return structure_edge


if __name__ == "__main__":
    key = jax.random.PRNGKey(0)
    k_feats, k_params = jax.random.split(key)

    N, D, ks = 16, 32, 5
    feats = jax.random.normal(k_feats, (N, D), jnp.float32)
    edge_dict = [
        [0, 3, 7, 9],
        [1],
        [2, 5],
        [3, 1, 4, 8, 12],
        [4, 10],
        [5, 2, 6],
        [6],
        [7, 0, 11, 13, 14, 15],
    ]

    attn = AttentionPallas(dim_in=D, key=k_params)

    # sanity check the projection kernel (lane-dense (2, N), no-pad grid)
    qk_dev = np.asarray(jax.block_until_ready(qk_projection(feats, attn.W, attn.b)))
    qk_ref = np.asarray(attn.W) @ np.asarray(feats).T + np.asarray(attn.b)  # (2, N)
    np.testing.assert_allclose(qk_dev, qk_ref, rtol=1e-5, atol=1e-5)

    # extra check: partial last block path (N not a multiple of tile_n)
    N2 = 600
    feats2 = jax.random.normal(jax.random.PRNGKey(1), (N2, D), jnp.float32)
    qk2_dev = np.asarray(jax.block_until_ready(qk_projection(feats2, attn.W, attn.b)))
    qk2_ref = np.asarray(attn.W) @ np.asarray(feats2).T + np.asarray(attn.b)
    np.testing.assert_allclose(qk2_dev, qk2_ref, rtol=1e-4, atol=1e-4)

    structure_edge = attn.forward(feats, edge_dict, ks)
    assert len(structure_edge) == len(edge_dict)
    assert all(len(row) == ks for row in structure_edge)

    # end-to-end comparison against a pure-numpy re-implementation of the module
    ref_edge = _reference_forward_numpy(feats, attn.W, attn.b, edge_dict, ks)
    assert structure_edge == ref_edge

    print("KERNEL_OK")
</pallas_src>

<mosaic_0001>
module attributes {stable_mosaic.version = 11 : i64} {
  func.func @qk_proj_kernel(%arg0: i32, %arg1: memref<16x32xf32, #tpu.memory_space<vmem>>, %arg2: memref<2x32xf32, #tpu.memory_space<vmem>>, %arg3: memref<2x1xf32, #tpu.memory_space<vmem>>, %arg4: memref<2x16xf32, #tpu.memory_space<vmem>>) attributes {dimension_semantics = [#tpu.dimension_semantics<parallel>], iteration_bounds = array<i64: 1>, scalar_prefetch = 0 : i64, scratch_operands = 0 : i64, tpu.core_type = #tpu.core_type<tc>, window_params = [{transform_indices = @transform_0, window_bounds = array<i64: 16, 32>}, {pipeline_mode = #tpu.pipeline_mode<synchronous>, transform_indices = @transform_1, window_bounds = array<i64: 2, 32>}, {pipeline_mode = #tpu.pipeline_mode<synchronous>, transform_indices = @transform_2, window_bounds = array<i64: 2, 1>}, {transform_indices = @transform_3, window_bounds = array<i64: 2, 16>}]} {
    %c0 = arith.constant 0 : index
    %c0_0 = arith.constant 0 : index
    %0 = vector.load %arg2[%c0, %c0_0] : memref<2x32xf32, #tpu.memory_space<vmem>>, vector<2x32xf32>
    %c0_1 = arith.constant 0 : index
    %c0_2 = arith.constant 0 : index
    %1 = vector.load %arg1[%c0_1, %c0_2] : memref<16x32xf32, #tpu.memory_space<vmem>>, vector<16x32xf32>
    %cst = arith.constant dense<0.000000e+00> : vector<2x16xf32>
    %2 = tpu.matmul %0, %1, %cst {dimension_numbers = #tpu.dot_dimension_numbers<[1], [1], [0], [0], [0, 0, 1, 0], [], []>} : vector<2x32xf32>, vector<16x32xf32>, vector<2x16xf32> -> vector<2x16xf32>
    %c0_3 = arith.constant 0 : index
    %c0_4 = arith.constant 0 : index
    %3 = vector.load %arg3[%c0_3, %c0_4] : memref<2x1xf32, #tpu.memory_space<vmem>>, vector<2x1xf32>
    %4 = vector.broadcast %3 : vector<2x1xf32> to vector<2x16xf32>
    %5 = arith.addf %2, %4 : vector<2x16xf32>
    %c0_5 = arith.constant 0 : index
    %c0_6 = arith.constant 0 : index
    %6 = vector.load %arg4[%c0_5, %c0_6] : memref<2x16xf32, #tpu.memory_space<vmem>>, vector<2x16xf32>
    tpu.vector_store %arg4[%c0_5, %c0_6], %5 {strides = array<i32>} : memref<2x16xf32, #tpu.memory_space<vmem>>, vector<2x16xf32>,
    return
  }
  func.func @transform_0(%arg0: i32) -> (i32, i32) {
    %c0_i32 = arith.constant 0 : i32
    %c0_i32_0 = arith.constant 0 : i32
    return %arg0, %c0_i32 : i32, i32
  }
  func.func @transform_1(%arg0: i32) -> (i32, i32) {
    %c0_i32 = arith.constant 0 : i32
    %c0_i32_0 = arith.constant 0 : i32
    %c0_i32_1 = arith.constant 0 : i32
    return %c0_i32, %c0_i32_0 : i32, i32
  }
  func.func @transform_2(%arg0: i32) -> (i32, i32) {
    %c0_i32 = arith.constant 0 : i32
    %c0_i32_0 = arith.constant 0 : i32
    %c0_i32_1 = arith.constant 0 : i32
    return %c0_i32, %c0_i32_0 : i32, i32
  }
  func.func @transform_3(%arg0: i32) -> (i32, i32) {
    %c0_i32 = arith.constant 0 : i32
    %c0_i32_0 = arith.constant 0 : i32
    return %c0_i32, %arg0 : i32, i32
  }
}

</mosaic_0001>

<bundles_post_ra>
// kernel: tpu_custom_call.1
= control target key start
LH: loop header
LB: loop body
LE: loop exit
PB: predicated region body
PF: predicated region fallthrough
CT: control target
= control target key end

     0   :  { %8 = vsyncpa [#allocation3], 0  ;;  %s239_s0 = inlined_call_operand.hbm [shape: f32[16,32], index: 0, kind: input, shape index: {}]   ;;  %s240_s1 = inlined_call_operand.vmem [shape: f32[2,32], index: 1, kind: input, shape index: {}]   ;;  %s241_s2 = inlined_call_operand.vmem [shape: f32[2,1], index: 2, kind: input, shape index: {}]   ;;  %s242_s3 = inlined_call_operand.hbm [shape: f32[2,16], index: 3, kind: output, shape index: {}]  }
   0x1   :  { %9 = vsyncpa [#allocation4], 0  ;;  %s200_s12 = smov [#allocation2]  }
   0x2   :  { %s15_s13 = sshll.u32 %s200_s12, 4  ;;  %s16_s13 = int_to_ptr.vmem [resolvable:$true] %s15_s13 }
   0x3   :  { %s164_s14 = scalar_lea.vmem %s16_s13, 256  ;;  %p169_p1 = scmp.lt.s32.totalorder %s16_s13, %s16_s13 }
   0x4   :  { %p165_p0 = scmp.ne.s32.totalorder %s16_s13, %s164_s14  ;;  %p170_p2 = scmp.lt.s32.totalorder %s164_s14, %s164_s14 }
   0x6   :  { %p171_p3 = por %p170_p2, %p169_p1 }
   0x8   :  { %p172_p4 = pnand %p171_p3, %p165_p0 }
   0xa   :  { %175 = shalt.err (!%p172_p4)
}
   0xb   :  { %s201_s15 = smov 128   ;;  %s202_s16 = smov 8  }
   0xc   :  { %21 = dma.hbm_to_vmem [thread:$0]  %s239_s0, 256, %s16_s13, [#allocation3], %s201_s15, %s201_s15, %s202_s16  }
   0xd   :  { %196 = dma.done.wait [#allocation3], 256  }
   0xe   :  { %197 = vsyncadd [#allocation3], 4294967040  ;;  %v203_v0 = vmov 0.0   ;;  %vm204_vm0 = vmmov 0   ;;  %v205_v1 = vmov 0   ;;  %vm38_vm1 = vcmask 261120  }
   0xf   :  { %141 = vmatprep.subr.mxu0 %v203_v0  ;;  %145 = vmatprep.mubr.msk.f32.mxu0 %vm204_vm0, %v203_v0  ;;  %v31_v2 = vld [vmem:[#allocation2 + $0x8] sm:$0xff]  ;;  %v32_v3 = vld [vmem:[%s241_s2] sm:$0x3]  ;;  %s206_s22 = smov [#allocation5]   ;;  %vm118_vm2 = vcmask 123904  }
  0x10   :  { %155 = vset.pattern.permute.xlu0 %v205_v1  ;;  %142 = vmatpush3.xpose.msk.msra.mxu0 %vm38_vm1, %v31_v2  ;;  %v30_v4 = vld [vmem:[#allocation2] sm:$0xff]  ;;  %s126_s23 = sshll.u32 %s206_s22, 4  ;;  %s127_s23 = int_to_ptr.vmem [resolvable:$true] %s126_s23 }
  0x11   :  { %143 = vmatprep.subr.mxu0 %v203_v0  ;;  %35 = vperm.xlu0 %155, %v32_v3   ;;  %v29_v5 = vld [vmem:[%s240_s1] sm:$0x3]  ;;  %s176_s24 = scalar_lea.vmem %s127_s23, 32  ;;  %p181_p6 = scmp.lt.s32.totalorder %s127_s23, %s127_s23 }
  0x12   :  { %p177_p5 = scmp.ne.s32.totalorder %s127_s23, %s176_s24  ;;  %p182_p7 = scmp.lt.s32.totalorder %s176_s24, %s176_s24 }
  0x14   :  { %144 = vmatpush3.xpose.msk.msra.mxu0 %vm38_vm1, %v30_v4  ;;  %p183_p8 = por %p182_p7, %p181_p6 }
  0x16   :  { %p184_p9 = pnand %p183_p8, %p177_p5 }
  0x17   :  { %146 = vmatmul.mubr.msk.f32.vlgmr.msra.gmra.mxu0 %vm38_vm1, %v29_v5 }
  0x8c   :  { %v36_v6 = vpop.permute.xlu0 %35 }
  0xd7   :  { %v114_v7 = vpop.f32.mrf.mxu0 }
  0xd8   :  { %v115_v8 = vadd.f32 %v114_v7, %v36_v6 }
  0xd9   :  { %v147_v9 = vpop.f32.mrf.mxu0 }
  0xda   :  { %119 = vst.msk [vmem:[#allocation5] sm:$0x3] %vm118_vm2, %v115_v8 }
  0xdb   :  { %187 = shalt.err (!%p184_p9)
}
  0xdc   :  { %129 = dma.vmem_to_hbm [thread:$0]  %s127_s23, 32, %s242_s3, [#allocation4]  }
  0xdd   :  { %198 = dma.done.wait [#allocation4], 32  }
  0xde   :  { %199 = vsyncadd [#allocation4], 4294967264 }
  0xdf   :  { %133 = vsyncpa [#allocation3], 1 }
  0xe0   :  { %134 = vsyncpa [#allocation4], 1 }

</bundles_post_ra>
